<compile_context>
chip_gen: v7x
topology: tpu7x:2x2x1
jax: 0.10.0
libtpu: 0.0.40
codegen_flags: <defaults>
</compile_context>

<pallas_src>
import jax
import jax.numpy as jnp
from jax.experimental import pallas as pl
from jax.experimental.pallas import tpu as pltpu

_F = 128  # padded lane width used for every layer


def _round_up(x, m):
    return ((x + m - 1) // m) * m


# ---------------------------------------------------------------------------
# Pallas kernel: entire forward (fused encoders + concat + fc stack + head).
# ---------------------------------------------------------------------------
def _decoder_kernel(task_ref, state_ref, act_ref,
                    w0s_ref, w0a_ref, w0t_ref, w_ref, b_ref, out_ref):
    """task/state/act: (TB, T/S/A) f32; w0*: (K,128) bf16;
    w_ref: (3,128,128) bf16 (fc0, fc1, out); b_ref: (5,128) f32
    (rows 0..3 = biases, row 4 = passthrough 'keep' mask)."""
    f32 = jnp.float32
    bf16 = jnp.bfloat16

    s = state_ref[...].astype(bf16)          # (TB, S)
    a = act_ref[...].astype(bf16)            # (TB, A)
    t = task_ref[...].astype(bf16)           # (TB, T)

    # Layer 0: fused state/action encoders + identity passthrough of the task
    # embedding (w0t carries an eye block).  Output layout: [hs | ha | task | 0].
    h0 = (jnp.dot(s, w0s_ref[...], preferred_element_type=f32)
          + jnp.dot(a, w0a_ref[...], preferred_element_type=f32)
          + jnp.dot(t, w0t_ref[...], preferred_element_type=f32)
          + b_ref[0:1, :])                   # (TB, 128) f32

    # Masked relu: keep-row is 0.0 on encoder columns (-> relu) and 1.0 on the
    # task passthrough columns (-> identity).  max(x, x*0)=relu, max(x, x*1)=x.
    h = jnp.maximum(h0, h0 * b_ref[4:5, :]).astype(bf16)

    # fc stack; fc0's weight rows are permuted to absorb the concat layout.
    h = jnp.maximum(
        jnp.dot(h, w_ref[0], preferred_element_type=f32) + b_ref[1:2, :], 0.0
    ).astype(bf16)
    h = jnp.maximum(
        jnp.dot(h, w_ref[1], preferred_element_type=f32) + b_ref[2:3, :], 0.0
    ).astype(bf16)

    # Output head (no activation); lane-dense 128-wide bf16 store.
    out_ref[...] = (
        jnp.dot(h, w_ref[2], preferred_element_type=f32) + b_ref[3:4, :]
    ).astype(out_ref.dtype)


# ---------------------------------------------------------------------------
# Parameter packing: fold encoders / concat / padding into resident tiles.
# ---------------------------------------------------------------------------
def pack_params(params, *, task_embedding_size, state_size, action_size,
                state_embed_size, action_embed_size, layers, out_dim):
    T, S, A = task_embedding_size, state_size, action_size
    SE, AE = state_embed_size, action_embed_size
    H0, H1 = layers
    assert SE + AE + T <= _F, "layer-0 output must fit in 128 lanes"
    assert max(S, A, T, H0, H1, out_dim) <= _F

    task_col = SE + AE  # layer-0 output column where the task passthrough starts

    # Layer-0 blocks: each input gets its own (K,128) weight slab whose output
    # columns are disjoint, so summing the three dots == the fused layer.
    w0s = jnp.zeros((S, _F), jnp.float32).at[:, 0:SE].set(params["w_state"])
    w0a = jnp.zeros((A, _F), jnp.float32).at[:, SE:SE + AE].set(params["w_action"])
    w0t = jnp.zeros((T, _F), jnp.float32).at[:, task_col:task_col + T].set(
        jnp.eye(T, dtype=jnp.float32))
    b0 = jnp.zeros((_F,), jnp.float32)
    b0 = b0.at[0:SE].set(params["b_state"][0])
    b0 = b0.at[SE:SE + AE].set(params["b_action"][0])

    # fc0: rows permuted to the layer-0 output layout [hs | ha | task | 0-pad].
    w1 = jnp.zeros((_F, _F), jnp.float32)
    w1 = w1.at[0:SE, 0:H0].set(params["w_fc0_hs"])
    w1 = w1.at[SE:SE + AE, 0:H0].set(params["w_fc0_ha"])
    w1 = w1.at[task_col:task_col + T, 0:H0].set(params["w_fc0_task"])
    b1 = jnp.zeros((_F,), jnp.float32).at[0:H0].set(params["b_fc0"][0])

    w2 = jnp.zeros((_F, _F), jnp.float32).at[0:H0, 0:H1].set(params["w_fc1"])
    b2 = jnp.zeros((_F,), jnp.float32).at[0:H1].set(params["b_fc1"][0])

    w3 = jnp.zeros((_F, _F), jnp.float32).at[0:H1, 0:out_dim].set(params["w_out"])
    b3 = jnp.zeros((_F,), jnp.float32).at[0:out_dim].set(params["b_out"][0])

    # Precomputed layer-0 relu mask: 0.0 -> relu column, 1.0 -> passthrough.
    keep = jnp.zeros((_F,), jnp.float32).at[task_col:].set(1.0)

    w_stack = jnp.stack([w1, w2, w3]).astype(jnp.bfloat16)   # (3,128,128) bf16
    b_stack = jnp.stack([b0, b1, b2, b3, keep])              # (5,128)     f32
    return (w0s.astype(jnp.bfloat16), w0a.astype(jnp.bfloat16),
            w0t.astype(jnp.bfloat16), w_stack, b_stack)


# ---------------------------------------------------------------------------
# Wrapper: one pallas_call with a parallel batch grid.
# ---------------------------------------------------------------------------
def state_transition_decoder_forward(task_embedding, state, action, params, *,
                                     tile_b=2048, return_padded=False):
    B, T = task_embedding.shape
    S, A = state.shape[1], action.shape[1]
    SE, AE = params["w_state"].shape[1], params["w_action"].shape[1]
    H0, H1 = params["w_fc1"].shape
    out_dim = params["w_out"].shape[1]

    w0s, w0a, w0t, w_stack, b_stack = pack_params(
        params, task_embedding_size=T, state_size=S, action_size=A,
        state_embed_size=SE, action_embed_size=AE, layers=(H0, H1),
        out_dim=out_dim)

    # Batch tiling: multiples of 16 (bf16 output block), large tiles to
    # amortize grid-step overhead, and >=2 grid steps when the batch allows so
    # the "parallel" axis can shard across both TensorCores on v7x.
    tile_b = max(16, _round_up(tile_b, 16))
    n_steps = max(1, pl.cdiv(B, tile_b))
    if B >= 32:
        n_steps = max(n_steps, 2)
    tb = _round_up(pl.cdiv(_round_up(B, 16), n_steps), 16)
    bp = _round_up(B, tb)

    def pad_rows(x):
        return x if bp == B else jnp.pad(x, ((0, bp - B), (0, 0)))

    task_p, state_p, act_p = map(pad_rows, (task_embedding, state, action))

    out = pl.pallas_call(
        _decoder_kernel,
        out_shape=jax.ShapeDtypeStruct((bp, _F), jnp.bfloat16),
        grid=(bp // tb,),
        in_specs=[
            pl.BlockSpec((tb, T), lambda i: (i, 0)),           # task       (row-tiled)
            pl.BlockSpec((tb, S), lambda i: (i, 0)),           # state      (row-tiled)
            pl.BlockSpec((tb, A), lambda i: (i, 0)),           # action     (row-tiled)
            pl.BlockSpec((S, _F), lambda i: (0, 0)),           # w0 state   (resident)
            pl.BlockSpec((A, _F), lambda i: (0, 0)),           # w0 action  (resident)
            pl.BlockSpec((T, _F), lambda i: (0, 0)),           # w0 task    (resident)
            pl.BlockSpec((3, _F, _F), lambda i: (0, 0, 0)),    # fc weights (resident)
            pl.BlockSpec((5, _F), lambda i: (0, 0)),           # biases+mask(resident)
        ],
        out_specs=pl.BlockSpec((tb, _F), lambda i: (i, 0)),
        compiler_params=pltpu.CompilerParams(
            dimension_semantics=("parallel",)),
    )(task_p, state_p, act_p, w0s, w0a, w0t, w_stack, b_stack)

    if return_padded:
        # (bp, 128) bf16 slab; valid data lives at [:B, :out_dim].  Lets the
        # consumer fuse the slice/cast and avoid an extra HBM pass.
        return out
    return out[:B, :out_dim]


# ---------------------------------------------------------------------------
# Deterministic parameter construction (PyTorch-default-style uniform init).
# ---------------------------------------------------------------------------
def _linear_params(key, fan_in, fan_out):
    kw, kb = jax.random.split(key)
    bound = 1.0 / jnp.sqrt(jnp.float32(fan_in))
    w = jax.random.uniform(kw, (fan_in, fan_out), jnp.float32, -bound, bound)
    b = jax.random.uniform(kb, (1, fan_out), jnp.float32, -bound, bound)
    return w, b


def make_params(key, task_embedding_size, layers, action_size, action_embed_size,
                state_size, state_embed_size, pred_type="deterministic"):
    assert len(layers) == 2, "this script instantiates the 2-hidden-layer config"
    keys = jax.random.split(key, 5)
    w_state, b_state = _linear_params(keys[0], state_size, state_embed_size)
    w_action, b_action = _linear_params(keys[1], action_size, action_embed_size)

    curr = task_embedding_size + state_embed_size + action_embed_size
    w_fc0, b_fc0 = _linear_params(keys[2], curr, layers[0])
    # split first fc weight along the concat axis: [task | hs | ha]
    w_fc0_task = w_fc0[:task_embedding_size]
    w_fc0_hs = w_fc0[task_embedding_size:task_embedding_size + state_embed_size]
    w_fc0_ha = w_fc0[task_embedding_size + state_embed_size:]

    w_fc1, b_fc1 = _linear_params(keys[3], layers[0], layers[1])

    out_dim = 2 * state_size if pred_type == "gaussian" else state_size
    w_out, b_out = _linear_params(keys[4], layers[1], out_dim)

    return dict(
        w_state=w_state, b_state=b_state,
        w_action=w_action, b_action=b_action,
        w_fc0_task=w_fc0_task, w_fc0_hs=w_fc0_hs, w_fc0_ha=w_fc0_ha, b_fc0=b_fc0,
        w_fc1=w_fc1, b_fc1=b_fc1,
        w_out=w_out, b_out=b_out,
    )


# ---------------------------------------------------------------------------
# References.
# ---------------------------------------------------------------------------
def reference_forward(task_embedding, state, action, params):
    """Pure-f32 JAX reference matching the PyTorch forward (concat form)."""
    hs = jax.nn.relu(state @ params["w_state"] + params["b_state"])
    ha = jax.nn.relu(action @ params["w_action"] + params["b_action"])
    h = jnp.concatenate([task_embedding, hs, ha], axis=-1)
    w_fc0 = jnp.concatenate(
        [params["w_fc0_task"], params["w_fc0_hs"], params["w_fc0_ha"]], axis=0)
    h = jax.nn.relu(h @ w_fc0 + params["b_fc0"])
    h = jax.nn.relu(h @ params["w_fc1"] + params["b_fc1"])
    return h @ params["w_out"] + params["b_out"]


def reference_forward_bf16(task_embedding, state, action, params):
    """Reference emulating the kernel's bf16-operand / f32-accumulate matmuls."""
    def mm(x, w):
        return jnp.dot(x.astype(jnp.bfloat16), w.astype(jnp.bfloat16),
                       preferred_element_type=jnp.float32)
    hs = jax.nn.relu(mm(state, params["w_state"]) + params["b_state"])
    ha = jax.nn.relu(mm(action, params["w_action"]) + params["b_action"])
    h = jnp.concatenate([task_embedding, hs, ha], axis=-1)
    w_fc0 = jnp.concatenate(
        [params["w_fc0_task"], params["w_fc0_hs"], params["w_fc0_ha"]], axis=0)
    h = jax.nn.relu(mm(h, w_fc0) + params["b_fc0"])
    h = jax.nn.relu(mm(h, params["w_fc1"]) + params["b_fc1"])
    return mm(h, params["w_out"]) + params["b_out"]


if __name__ == "__main__":
    # Small, forward-consistent config.
    batch = 8
    task_embedding_size = 32
    state_size = 16
    action_size = 8
    state_embed_size = 32
    action_embed_size = 16
    layers = (64, 64)

    root = jax.random.PRNGKey(0)
    k_params, k_task, k_state, k_action = jax.random.split(root, 4)

    params = make_params(k_params, task_embedding_size, layers, action_size,
                         action_embed_size, state_size, state_embed_size,
                         pred_type="deterministic")

    task_embedding = jax.random.normal(k_task, (batch, task_embedding_size), jnp.float32)
    state = jax.random.normal(k_state, (batch, state_size), jnp.float32)
    action = jax.random.normal(k_action, (batch, action_size), jnp.float32)

    out = state_transition_decoder_forward(task_embedding, state, action, params)
    out = jax.block_until_ready(out)
    assert out.shape == (batch, state_size)
    out_f32 = out.astype(jnp.float32)

    # Kernel output is bf16; compare with tolerances that cover the final cast.
    ref_bf16 = reference_forward_bf16(task_embedding, state, action, params)
    ref_f32 = reference_forward(task_embedding, state, action, params)
    assert jnp.allclose(out_f32, ref_bf16, atol=3e-2, rtol=3e-2), \
        "mismatch vs bf16-emulated reference"
    assert jnp.allclose(out_f32, ref_f32, atol=1e-1, rtol=1e-1), \
        "mismatch vs f32 reference"

    print("KERNEL_OK")
</pallas_src>

<mosaic_0001>
module attributes {stable_mosaic.version = 11 : i64} {
  func.func @_decoder_kernel(%arg0: i32, %arg1: memref<16x32xf32, #tpu.memory_space<vmem>>, %arg2: memref<16x16xf32, #tpu.memory_space<vmem>>, %arg3: memref<16x8xf32, #tpu.memory_space<vmem>>, %arg4: memref<16x128xbf16, #tpu.memory_space<vmem>>, %arg5: memref<8x128xbf16, #tpu.memory_space<vmem>>, %arg6: memref<32x128xbf16, #tpu.memory_space<vmem>>, %arg7: memref<3x128x128xbf16, #tpu.memory_space<vmem>>, %arg8: memref<5x128xf32, #tpu.memory_space<vmem>>, %arg9: memref<16x128xbf16, #tpu.memory_space<vmem>>) attributes {dimension_semantics = [#tpu.dimension_semantics<parallel>], iteration_bounds = array<i64: 1>, scalar_prefetch = 0 : i64, scratch_operands = 0 : i64, tpu.core_type = #tpu.core_type<tc>, window_params = [{transform_indices = @transform_0, window_bounds = array<i64: 16, 32>}, {transform_indices = @transform_1, window_bounds = array<i64: 16, 16>}, {transform_indices = @transform_2, window_bounds = array<i64: 16, 8>}, {pipeline_mode = #tpu.pipeline_mode<synchronous>, transform_indices = @transform_3, window_bounds = array<i64: 16, 128>}, {pipeline_mode = #tpu.pipeline_mode<synchronous>, transform_indices = @transform_4, window_bounds = array<i64: 8, 128>}, {pipeline_mode = #tpu.pipeline_mode<synchronous>, transform_indices = @transform_5, window_bounds = array<i64: 32, 128>}, {pipeline_mode = #tpu.pipeline_mode<synchronous>, transform_indices = @transform_6, window_bounds = array<i64: 3, 128, 128>}, {pipeline_mode = #tpu.pipeline_mode<synchronous>, transform_indices = @transform_7, window_bounds = array<i64: 5, 128>}, {transform_indices = @transform_8, window_bounds = array<i64: 16, 128>}]} {
    %c0 = arith.constant 0 : index
    %c0_0 = arith.constant 0 : index
    %0 = vector.load %arg2[%c0, %c0_0] : memref<16x16xf32, #tpu.memory_space<vmem>>, vector<16x16xf32>
    %1 = arith.truncf %0 : vector<16x16xf32> to vector<16x16xbf16>
    %c0_1 = arith.constant 0 : index
    %c0_2 = arith.constant 0 : index
    %2 = vector.load %arg3[%c0_1, %c0_2] : memref<16x8xf32, #tpu.memory_space<vmem>>, vector<16x8xf32>
    %3 = arith.truncf %2 : vector<16x8xf32> to vector<16x8xbf16>
    %c0_3 = arith.constant 0 : index
    %c0_4 = arith.constant 0 : index
    %4 = vector.load %arg1[%c0_3, %c0_4] : memref<16x32xf32, #tpu.memory_space<vmem>>, vector<16x32xf32>
    %5 = arith.truncf %4 : vector<16x32xf32> to vector<16x32xbf16>
    %c0_5 = arith.constant 0 : index
    %c0_6 = arith.constant 0 : index
    %6 = vector.load %arg4[%c0_5, %c0_6] : memref<16x128xbf16, #tpu.memory_space<vmem>>, vector<16x128xbf16>
    %cst = arith.constant dense<0.000000e+00> : vector<16x128xf32>
    %7 = tpu.matmul %1, %6, %cst {dimension_numbers = #tpu.dot_dimension_numbers<[1], [0], [0], [1], [0, 0, 1, 1], [], []>} : vector<16x16xbf16>, vector<16x128xbf16>, vector<16x128xf32> -> vector<16x128xf32>
    %c0_7 = arith.constant 0 : index
    %c0_8 = arith.constant 0 : index
    %8 = vector.load %arg5[%c0_7, %c0_8] : memref<8x128xbf16, #tpu.memory_space<vmem>>, vector<8x128xbf16>
    %cst_9 = arith.constant dense<0.000000e+00> : vector<16x128xf32>
    %9 = tpu.matmul %3, %8, %cst_9 {dimension_numbers = #tpu.dot_dimension_numbers<[1], [0], [0], [1], [0, 0, 1, 1], [], []>} : vector<16x8xbf16>, vector<8x128xbf16>, vector<16x128xf32> -> vector<16x128xf32>
    %10 = arith.addf %7, %9 : vector<16x128xf32>
    %c0_10 = arith.constant 0 : index
    %c0_11 = arith.constant 0 : index
    %11 = vector.load %arg6[%c0_10, %c0_11] : memref<32x128xbf16, #tpu.memory_space<vmem>>, vector<32x128xbf16>
    %cst_12 = arith.constant dense<0.000000e+00> : vector<16x128xf32>
    %12 = tpu.matmul %5, %11, %cst_12 {dimension_numbers = #tpu.dot_dimension_numbers<[1], [0], [0], [1], [0, 0, 1, 1], [], []>} : vector<16x32xbf16>, vector<32x128xbf16>, vector<16x128xf32> -> vector<16x128xf32>
    %13 = arith.addf %10, %12 : vector<16x128xf32>
    %c0_13 = arith.constant 0 : index
    %c0_14 = arith.constant 0 : index
    %14 = vector.load %arg8[%c0_13, %c0_14] : memref<5x128xf32, #tpu.memory_space<vmem>>, vector<1x128xf32>
    %15 = vector.broadcast %14 : vector<1x128xf32> to vector<16x128xf32>
    %16 = arith.addf %13, %15 : vector<16x128xf32>
    %c4 = arith.constant 4 : index
    %c0_15 = arith.constant 0 : index
    %17 = vector.load %arg8[%c4, %c0_15] : memref<5x128xf32, #tpu.memory_space<vmem>>, vector<1x128xf32>
    %18 = vector.broadcast %17 : vector<1x128xf32> to vector<16x128xf32>
    %19 = arith.mulf %16, %18 : vector<16x128xf32>
    %20 = arith.maximumf %16, %19 : vector<16x128xf32>
    %21 = arith.truncf %20 : vector<16x128xf32> to vector<16x128xbf16>
    %c0_16 = arith.constant 0 : index
    %c0_17 = arith.constant 0 : index
    %c0_18 = arith.constant 0 : index
    %22 = vector.load %arg7[%c0_16, %c0_17, %c0_18] : memref<3x128x128xbf16, #tpu.memory_space<vmem>>, vector<1x128x128xbf16>
    %23 = vector.shape_cast %22 : vector<1x128x128xbf16> to vector<128x128xbf16>
    %cst_19 = arith.constant dense<0.000000e+00> : vector<16x128xf32>
    %24 = tpu.matmul %21, %23, %cst_19 {dimension_numbers = #tpu.dot_dimension_numbers<[1], [0], [0], [1], [0, 0, 1, 1], [], []>} : vector<16x128xbf16>, vector<128x128xbf16>, vector<16x128xf32> -> vector<16x128xf32>
    %c1 = arith.constant 1 : index
    %c0_20 = arith.constant 0 : index
    %25 = vector.load %arg8[%c1, %c0_20] : memref<5x128xf32, #tpu.memory_space<vmem>>, vector<1x128xf32>
    %26 = vector.broadcast %25 : vector<1x128xf32> to vector<16x128xf32>
    %27 = arith.addf %24, %26 : vector<16x128xf32>
    %cst_21 = arith.constant 0.000000e+00 : f32
    %28 = vector.broadcast %cst_21 : f32 to vector<16x128xf32>
    %29 = arith.maximumf %27, %28 : vector<16x128xf32>
    %30 = arith.truncf %29 : vector<16x128xf32> to vector<16x128xbf16>
    %c1_22 = arith.constant 1 : index
    %c0_23 = arith.constant 0 : index
    %c0_24 = arith.constant 0 : index
    %31 = vector.load %arg7[%c1_22, %c0_23, %c0_24] : memref<3x128x128xbf16, #tpu.memory_space<vmem>>, vector<1x128x128xbf16>
    %32 = vector.shape_cast %31 : vector<1x128x128xbf16> to vector<128x128xbf16>
    %cst_25 = arith.constant dense<0.000000e+00> : vector<16x128xf32>
    %33 = tpu.matmul %30, %32, %cst_25 {dimension_numbers = #tpu.dot_dimension_numbers<[1], [0], [0], [1], [0, 0, 1, 1], [], []>} : vector<16x128xbf16>, vector<128x128xbf16>, vector<16x128xf32> -> vector<16x128xf32>
    %c2 = arith.constant 2 : index
    %c0_26 = arith.constant 0 : index
    %34 = vector.load %arg8[%c2, %c0_26] : memref<5x128xf32, #tpu.memory_space<vmem>>, vector<1x128xf32>
    %35 = vector.broadcast %34 : vector<1x128xf32> to vector<16x128xf32>
    %36 = arith.addf %33, %35 : vector<16x128xf32>
    %cst_27 = arith.constant 0.000000e+00 : f32
    %37 = vector.broadcast %cst_27 : f32 to vector<16x128xf32>
    %38 = arith.maximumf %36, %37 : vector<16x128xf32>
    %39 = arith.truncf %38 : vector<16x128xf32> to vector<16x128xbf16>
    %c2_28 = arith.constant 2 : index
    %c0_29 = arith.constant 0 : index
    %c0_30 = arith.constant 0 : index
    %40 = vector.load %arg7[%c2_28, %c0_29, %c0_30] : memref<3x128x128xbf16, #tpu.memory_space<vmem>>, vector<1x128x128xbf16>
    %41 = vector.shape_cast %40 : vector<1x128x128xbf16> to vector<128x128xbf16>
    %cst_31 = arith.constant dense<0.000000e+00> : vector<16x128xf32>
    %42 = tpu.matmul %39, %41, %cst_31 {dimension_numbers = #tpu.dot_dimension_numbers<[1], [0], [0], [1], [0, 0, 1, 1], [], []>} : vector<16x128xbf16>, vector<128x128xbf16>, vector<16x128xf32> -> vector<16x128xf32>
    %c3 = arith.constant 3 : index
    %c0_32 = arith.constant 0 : index
    %43 = vector.load %arg8[%c3, %c0_32] : memref<5x128xf32, #tpu.memory_space<vmem>>, vector<1x128xf32>
    %44 = vector.broadcast %43 : vector<1x128xf32> to vector<16x128xf32>
    %45 = arith.addf %42, %44 : vector<16x128xf32>
    %46 = arith.truncf %45 : vector<16x128xf32> to vector<16x128xbf16>
    %c0_33 = arith.constant 0 : index
    %c0_34 = arith.constant 0 : index
    %47 = vector.load %arg9[%c0_33, %c0_34] : memref<16x128xbf16, #tpu.memory_space<vmem>>, vector<16x128xbf16>
    tpu.vector_store %arg9[%c0_33, %c0_34], %46 {strides = array<i32>} : memref<16x128xbf16, #tpu.memory_space<vmem>>, vector<16x128xbf16>,
    return
  }
  func.func @transform_0(%arg0: i32) -> (i32, i32) {
    %c0_i32 = arith.constant 0 : i32
    %c0_i32_0 = arith.constant 0 : i32
    return %arg0, %c0_i32 : i32, i32
  }
  func.func @transform_1(%arg0: i32) -> (i32, i32) {
    %c0_i32 = arith.constant 0 : i32
    %c0_i32_0 = arith.constant 0 : i32
    return %arg0, %c0_i32 : i32, i32
  }
  func.func @transform_2(%arg0: i32) -> (i32, i32) {
    %c0_i32 = arith.constant 0 : i32
    %c0_i32_0 = arith.constant 0 : i32
    return %arg0, %c0_i32 : i32, i32
  }
  func.func @transform_3(%arg0: i32) -> (i32, i32) {
    %c0_i32 = arith.constant 0 : i32
    %c0_i32_0 = arith.constant 0 : i32
    %c0_i32_1 = arith.constant 0 : i32
    return %c0_i32, %c0_i32_0 : i32, i32
  }
  func.func @transform_4(%arg0: i32) -> (i32, i32) {
    %c0_i32 = arith.constant 0 : i32
    %c0_i32_0 = arith.constant 0 : i32
    %c0_i32_1 = arith.constant 0 : i32
    return %c0_i32, %c0_i32_0 : i32, i32
  }
  func.func @transform_5(%arg0: i32) -> (i32, i32) {
    %c0_i32 = arith.constant 0 : i32
    %c0_i32_0 = arith.constant 0 : i32
    %c0_i32_1 = arith.constant 0 : i32
    return %c0_i32, %c0_i32_0 : i32, i32
  }
  func.func @transform_6(%arg0: i32) -> (i32, i32, i32) {
    %c0_i32 = arith.constant 0 : i32
    %c0_i32_0 = arith.constant 0 : i32
    %c0_i32_1 = arith.constant 0 : i32
    %c0_i32_2 = arith.constant 0 : i32
    return %c0_i32, %c0_i32_0, %c0_i32_1 : i32, i32, i32
  }
  func.func @transform_7(%arg0: i32) -> (i32, i32) {
    %c0_i32 = arith.constant 0 : i32
    %c0_i32_0 = arith.constant 0 : i32
    %c0_i32_1 = arith.constant 0 : i32
    return %c0_i32, %c0_i32_0 : i32, i32
  }
  func.func @transform_8(%arg0: i32) -> (i32, i32) {
    %c0_i32 = arith.constant 0 : i32
    %c0_i32_0 = arith.constant 0 : i32
    return %arg0, %c0_i32 : i32, i32
  }
}

</mosaic_0001>

<bundles_post_ra>
// kernel: tpu_custom_call.1
= control target key start
LH: loop header
LB: loop body
LE: loop exit
PB: predicated region body
PF: predicated region fallthrough
CT: control target
= control target key end

     0   :  { %13 = vsyncpa [#allocation3], 0  ;;  %s1162_s0 = inlined_call_operand.vmem [shape: f32[16,32], index: 0, kind: input, shape index: {}]   ;;  %s1163_s1 = inlined_call_operand.hbm [shape: f32[16,16], index: 1, kind: input, shape index: {}]   ;;  %s1164_s2 = inlined_call_operand.vmem [shape: f32[16,8], index: 2, kind: input, shape index: {}]   ;;  %s1165_s3 = inlined_call_operand.hbm [shape: bf16[16,128], index: 3, kind: input, shape index: {}]   ;;  %s1166_s4 = inlined_call_operand.hbm [shape: bf16[8,128], index: 4, kind: input, shape index: {}]   ;;  %s1167_s5 = inlined_call_operand.vmem [shape: bf16[32,128], index: 5, kind: input, shape index: {}]   ;;  %s1168_s6 = inlined_call_operand.hbm [shape: bf16[3,128,128], index: 6, kind: input, shape index: {}]   ;;  %s1169_s7 = inlined_call_operand.vmem [shape: f32[5,128], index: 7, kind: input, shape index: {}]   ;;  %s1170_s8 = inlined_call_operand.hbm [shape: bf16[16,128], index: 8, kind: output, shape index: {}]  }
   0x1   :  { %14 = vsyncpa [#allocation6], 0 }
   0x2   :  { %15 = vsyncpa [#allocation9], 0 }
   0x3   :  { %16 = vsyncpa [#allocation4], 0  ;;  %s957_s27 = smov [#allocation5]   ;;  %s839_s9 = scalar_lea.hbm %s1165_s3, 128 }
   0x4   :  { %s38_s28 = sshll.u32 %s957_s27, 4  ;;  %p840_p0 = scmp.ne.s32.totalorder %s1165_s3, %s839_s9  ;;  %s39_s28 = int_to_ptr.vmem [resolvable:$true] %s38_s28 }
   0x5   :  { %p843_p1 = scmp.lt.u32.totalorder %s839_s9, %s1165_s3 }
   0x7   :  { %p845_p2 = pnand %p843_p1, %p840_p0 }
   0x9   :  { %848 = shalt.err (!%p845_p2)
}
   0xa   :  { %s849_s14 = scalar_lea.vmem %s39_s28, 128  ;;  %p854_p4 = scmp.lt.s32.totalorder %s39_s28, %s39_s28 }
   0xb   :  { %p850_p3 = scmp.ne.s32.totalorder %s39_s28, %s849_s14  ;;  %p855_p5 = scmp.lt.s32.totalorder %s849_s14, %s849_s14 }
   0xd   :  { %p856_p6 = por %p855_p5, %p854_p4 }
   0xf   :  { %p857_p7 = pnand %p856_p6, %p850_p3 }
  0x11   :  { %860 = shalt.err (!%p857_p7)
}
  0x12   :  { %s958_s15 = smov 64   ;;  %s959_s16 = smov 4  }
  0x13   :  { %44 = dma.hbm_to_vmem [thread:$0]  %s1165_s3, 128, %s39_s28, [#allocation6], %s958_s15, %s958_s15, %s959_s16  }
  0x14   :  { %s960_s19 = smov [#allocation2]   ;;  %s861_s23 = scalar_lea.hbm %s1163_s1, 256 }
  0x15   :  { %s24_s20 = sshll.u32 %s960_s19, 4  ;;  %p862_p8 = scmp.ne.s32.totalorder %s1163_s1, %s861_s23  ;;  %s25_s20 = int_to_ptr.vmem [resolvable:$true] %s24_s20 }
  0x16   :  { %p865_p9 = scmp.lt.u32.totalorder %s861_s23, %s1163_s1 }
  0x18   :  { %p867_p10 = pnand %p865_p9, %p862_p8 }
  0x1a   :  { %870 = shalt.err (!%p867_p10)
}
  0x1b   :  { %s871_s29 = scalar_lea.vmem %s25_s20, 256  ;;  %p876_p12 = scmp.lt.s32.totalorder %s25_s20, %s25_s20 }
  0x1c   :  { %p872_p11 = scmp.ne.s32.totalorder %s25_s20, %s871_s29  ;;  %p877_p13 = scmp.lt.s32.totalorder %s871_s29, %s871_s29 }
  0x1e   :  { %p878_p0 = por %p877_p13, %p876_p12 }
  0x20   :  { %p879_p1 = pnand %p878_p0, %p872_p11 }
  0x22   :  { %882 = shalt.err (!%p879_p1)
}
  0x23   :  { %s961_s3 = smov 128   ;;  %s962_s28 = smov 8  }
  0x24   :  { %30 = dma.hbm_to_vmem [thread:$0]  %s1163_s1, 256, %s25_s20, [#allocation3], %s961_s3, %s961_s3, %s962_s28  }
  0x25   :  { %s963_s10 = smov [#allocation7]   ;;  %s964_s12 = smov [#allocation8]  }
  0x26   :  { %s51_s11 = sshll.u32 %s963_s10, 4  ;;  %s62_s13 = sshll.u32 %s964_s12, 4  ;;  %s52_s11 = int_to_ptr.vmem [resolvable:$true] %s51_s11  ;;  %s1040_s13 = int_to_ptr.vmem [resolvable:$true] %s62_s13 }
  0x27   :  { %s883_s18 = scalar_lea.hbm %s1166_s4, 64 }
  0x28   :  { %p884_p2 = scmp.ne.s32.totalorder %s1166_s4, %s883_s18  ;;  %p887_p3 = scmp.lt.u32.totalorder %s883_s18, %s1166_s4 }
  0x2a   :  { %p889_p4 = pnand %p887_p3, %p884_p2 }
  0x2c   :  { %892 = shalt.err (!%p889_p4)
}
  0x2d   :  { %s893_s1 = scalar_lea.vmem %s52_s11, 64  ;;  %p898_p6 = scmp.lt.s32.totalorder %s52_s11, %s52_s11 }
  0x2e   :  { %p894_p5 = scmp.ne.s32.totalorder %s52_s11, %s893_s1  ;;  %p899_p7 = scmp.lt.s32.totalorder %s893_s1, %s893_s1 }
  0x30   :  { %p900_p8 = por %p899_p7, %p898_p6 }
  0x32   :  { %p901_p9 = pnand %p900_p8, %p894_p5 }
  0x34   :  { %904 = shalt.err (!%p901_p9)
}
  0x35   :  { %54 = dma.hbm_to_vmem [thread:$0]  %s1166_s4, 64, %s52_s11, [#allocation6]  }
  0x36   :  { %s905_s27 = scalar_lea.hbm %s1168_s6, 3072 }
  0x37   :  { %p906_p10 = scmp.ne.s32.totalorder %s1168_s6, %s905_s27  ;;  %p909_p11 = scmp.lt.u32.totalorder %s905_s27, %s1168_s6 }
  0x39   :  { %p911_p12 = pnand %p909_p11, %p906_p10 }
  0x3b   :  { %914 = shalt.err (!%p911_p12)
}
  0x3c   :  { %s915_s9 = scalar_lea.vmem %s1040_s13, 3072  ;;  %p920_p0 = scmp.lt.s32.totalorder %s1040_s13, %s1040_s13 }
  0x3d   :  { %p916_p13 = scmp.ne.s32.totalorder %s1040_s13, %s915_s9  ;;  %p921_p1 = scmp.lt.s32.totalorder %s915_s9, %s915_s9 }
  0x3f   :  { %p922_p2 = por %p921_p1, %p920_p0 }
  0x41   :  { %p923_p3 = pnand %p922_p2, %p916_p13 }
  0x43   :  { %926 = shalt.err (!%p923_p3)
}
  0x44   :  { %68 = dma.hbm_to_vmem [thread:$0]  %s1168_s6, 3072, %s1040_s13, [#allocation9], %s958_s15, %s958_s15, %s959_s16  }
  0x45   :  { %949 = dma.done.wait [#allocation3], 256  }
  0x46   :  { %950 = vsyncadd [#allocation3], 4294967040 }
  0x47   :  { %951 = dma.done.wait [#allocation6], 192  }
  0x48   :  { %952 = vsyncadd [#allocation6], 4294967104 }
  0x49   :  { %953 = dma.done.wait [#allocation9], 3072  }
  0x4a   :  { %954 = vsyncadd [#allocation9], 4294964224  ;;  %v965_v0 = vmov 0.0   ;;  %vm966_vm0 = vmmov 0   ;;  %vm100_vm1 = vcmask 1043456   ;;  %v87_v2 = vld [vmem:[%s1164_s2] sm:$0xff] }
  0x4b   :  { %721 = vmatprep.subr.bf16.mxu0 %v965_v0  ;;  %723 = vmatprep.mubr.msk.bf16.mxu0 %vm966_vm0, %v965_v0  ;;  %v95_v1 = vld [vmem:[#allocation7] sm:$0xf]  ;;  %v88_v3 = vld [vmem:[%s1164_s2 + $0x8] sm:$0xff]  ;;  %vm96_vm2 = vcmask 64512   ;;  %v812_v6 = vld [vmem:[#allocation5] sm:$0xff]   ;;  %vm151_vm3 = vcmask 130048  }
  0x4c   :  { %741 = vmatprep.subr.bf16.mxu1 %v965_v0  ;;  %757 = vmatprep.mubr.msk.bf16.mxu1 %vm966_vm0, %v965_v0  ;;  %v102_v4 = vsel %vm100_vm1, %v95_v1, 0  ;;  %v89_v5 = vpack.c.bf16 %v88_v3, %v87_v2  ;;  %v84_v7 = vld [vmem:[#allocation2] sm:$0xff]  ;;  %v85_v8 = vld [vmem:[#allocation2 + $0x8] sm:$0xff]  ;;  %vm212_vm4 = vcmask 261120   ;;  %v818_v18 = vld [vmem:[#allocation8 + $0x18] sm:$0xff]   ;;  %s967_s28 = smov [#allocation10]  }
  0x4d   :  { %722 = vmatpush3.bf16.msra.mxu0 %v102_v4  ;;  %v815_v9 = vld [vmem:[#allocation8] sm:$0xff]   ;;  %v86_v11 = vpack.c.bf16 %v85_v8, %v84_v7  ;;  %v814_v12 = vld [vmem:[%s1167_s5 + $0x8] sm:$0xff]   ;;  %v822_v22 = vld [vmem:[#allocation8 + $0x38] sm:$0xff]   ;;  %s629_s30 = sshll.u32 %s967_s28, 4  ;;  %s630_s30 = int_to_ptr.vmem [resolvable:$true] %s629_s30 }
  0x4e   :  { %727 = vmatprep.subr.bf16.mxu0 %v965_v0  ;;  %v813_v10 = vld [vmem:[%s1167_s5] sm:$0xff]   ;;  %742 = vmatpush3.bf16.msra.mxu1 %v815_v9  ;;  %v91_v14 = vld [vmem:[%s1162_s0 + $0x8] sm:$0xff]  ;;  %v826_v26 = vld [vmem:[#allocation8 + $0x58] sm:$0xff]   ;;  %s927_s9 = scalar_lea.vmem %s630_s30, 128  ;;  %p932_p5 = scmp.lt.s32.totalorder %s630_s30, %s630_s30 }
  0x4f   :  { %743 = vmatprep.subr.bf16.mxu1 %v965_v0  ;;  %v90_v13 = vld [vmem:[%s1162_s0] sm:$0xff]  ;;  %v817_v17 = vld [vmem:[#allocation8 + $0x10] sm:$0xff]   ;;  %v830_v55 = vld [vmem:[#allocation8 + $0x78] sm:$0xff]   ;;  %p928_p4 = scmp.ne.s32.totalorder %s630_s30, %s927_s9  ;;  %p933_p6 = scmp.lt.s32.totalorder %s927_s9, %s927_s9 }
  0x50   :  { %724 = vmatmul.mubr.msk.bf16.vlgmr.msra.gmra.mrb[0].mxu0 %vm96_vm2, %v89_v5  ;;  %v92_v15 = vpack.c.bf16 %v91_v14, %v90_v13  ;;  %v816_v16 = vld [vmem:[#allocation8 + $0x8] sm:$0xff]   ;;  %v819_v19 = vld [vmem:[#allocation8 + $0x20] sm:$0xff]   ;;  %v821_v21 = vld [vmem:[#allocation8 + $0x30] sm:$0xff]  }
  0x51   :  { %728 = vmatpush3.bf16.msra.mxu0 %v812_v6  ;;  %729 = vmatprep.mubr.msk.bf16.mxu0 %vm966_vm0, %v965_v0  ;;  %v820_v20 = vld [vmem:[#allocation8 + $0x28] sm:$0xff]   ;;  %v823_v23 = vld [vmem:[#allocation8 + $0x40] sm:$0xff]   ;;  %v825_v25 = vld [vmem:[#allocation8 + $0x50] sm:$0xff]   ;;  %p934_p7 = por %p933_p6, %p932_p5 }
  0x52   :  { %733 = vmatprep.subr.bf16.mxu0 %v965_v0  ;;  %744 = vmatpush3.bf16.msra.mxu1 %v816_v16  ;;  %v824_v24 = vld [vmem:[#allocation8 + $0x48] sm:$0xff]   ;;  %v827_v27 = vld [vmem:[#allocation8 + $0x60] sm:$0xff]   ;;  %v829_v54 = vld [vmem:[#allocation8 + $0x70] sm:$0xff]  }
  0x53   :  { %745 = vmatprep.subr.bf16.mxu1 %v965_v0  ;;  %v828_v28 = vld [vmem:[#allocation8 + $0x68] sm:$0xff]   ;;  %v649_v40 = vld [vmem:[%s1169_s7] ss:$0 sm:$0xff]  ;;  %v833_v58 = vld [vmem:[#allocation8 + $0x90] sm:$0xff]   ;;  %p935_p8 = pnand %p934_p7, %p928_p4 }
  0x54   :  { %v650_v43 = vld [vmem:[%s1169_s7 + $0x4] ss:$0 sm:$0xff]  ;;  %v831_v56 = vld [vmem:[#allocation8 + $0x80] sm:$0xff]   ;;  %v834_v59 = vld [vmem:[#allocation8 + $0x98] sm:$0xff]  }
  0x55   :  { %v832_v57 = vld [vmem:[#allocation8 + $0x88] sm:$0xff]   ;;  %v835_v60 = vld [vmem:[#allocation8 + $0xa0] sm:$0xff]   ;;  %v837_v9 = vld [vmem:[#allocation8 + $0xb0] sm:$0xff]  }
  0x56   :  { %746 = vmatpush3.bf16.msra.mxu1 %v817_v17  ;;  %v836_v61 = vld [vmem:[#allocation8 + $0xa8] sm:$0xff]   ;;  %v651_v62 = vld [vmem:[%s1169_s7 + $0x1] ss:$0 sm:$0xff] }
  0x57   :  { %747 = vmatprep.subr.bf16.mxu1 %v965_v0 }
  0x58   :  { %730 = vmatmul.mubr.msk.bf16.vlgmr.msra.gmra.mrb[4].mxu0 %vm151_vm3, %v86_v11  ;;  %v660_v11 = vld [vmem:[%s1169_s7 + $0x2] ss:$0 sm:$0xff] }
  0x59   :  { %734 = vmatpush3.bf16.msra.mxu0 %v813_v10  ;;  %737 = vmatprep.mubr.msk.bf16.mxu0 %vm966_vm0, %v965_v0  ;;  %v838_v10 = vld [vmem:[#allocation8 + $0xb8] sm:$0xff]  }
  0x5a   :  { %735 = vmatprep.subr.bf16.mxu0 %v965_v0  ;;  %748 = vmatpush3.bf16.msra.mxu1 %v818_v18 }
  0x5b   :  { %749 = vmatprep.subr.bf16.mxu1 %v965_v0 }
  0x5d   :  { %736 = vmatpush3.bf16.msra.mxu0 %v814_v12 }
  0x5e   :  { %761 = vmatprep.subr.bf16.mxu0 %v965_v0  ;;  %750 = vmatpush3.bf16.msra.mxu1 %v819_v19 }
  0x5f   :  { %751 = vmatprep.subr.bf16.mxu1 %v965_v0 }
  0x60   :  { %738 = vmatmul.mubr.msk.bf16.vlgmr.msra.gmra.mrb[8].mxu0 %vm212_vm4, %v92_v15 }
  0x61   :  { %777 = vmatprep.mubr.msk.bf16.mxu0 %vm966_vm0, %v965_v0  ;;  %762 = vmatpush3.bf16.msra.mxu0 %v823_v23 }
  0x62   :  { %752 = vmatpush3.bf16.msra.mxu1 %v820_v20  ;;  %763 = vmatprep.subr.bf16.mxu0 %v965_v0 }
  0x63   :  { %753 = vmatprep.subr.bf16.mxu1 %v965_v0 }
  0x65   :  { %764 = vmatpush3.bf16.msra.mxu0 %v824_v24 }
  0x66   :  { %754 = vmatpush3.bf16.msra.mxu1 %v821_v21  ;;  %765 = vmatprep.subr.bf16.mxu0 %v965_v0 }
  0x67   :  { %755 = vmatprep.subr.bf16.mxu1 %v965_v0 }
  0x69   :  { %766 = vmatpush3.bf16.msra.mxu0 %v825_v25 }
  0x6a   :  { %756 = vmatpush3.bf16.msra.mxu1 %v822_v22  ;;  %767 = vmatprep.subr.bf16.mxu0 %v965_v0 }
  0x6b   :  { %781 = vmatprep.subr.bf16.mxu1 %v965_v0 }
  0x6d   :  { %768 = vmatpush3.bf16.msra.mxu0 %v826_v26 }
  0x6e   :  { %769 = vmatprep.subr.bf16.mxu0 %v965_v0 }
  0x71   :  { %770 = vmatpush3.bf16.msra.mxu0 %v827_v27 }
  0x72   :  { %771 = vmatprep.subr.bf16.mxu0 %v965_v0 }
  0x75   :  { %772 = vmatpush3.bf16.msra.mxu0 %v828_v28 }
  0x76   :  { %773 = vmatprep.subr.bf16.mxu0 %v965_v0 }
  0x79   :  { %774 = vmatpush3.bf16.msra.mxu0 %v829_v54 }
  0x7a   :  { %775 = vmatprep.subr.bf16.mxu0 %v965_v0 }
  0x7d   :  { %776 = vmatpush3.bf16.msra.mxu0 %v830_v55 }
 0x123   :  { %v138_v29 = vpop.f32.mrb[0].mxu0 }
 0x124   :  { %v725_v30 = vpop.f32.mrb[1].mxu0 }
 0x125   :  { %v141_v31 = vpop.f32.mrb[2].mxu0 }
 0x126   :  { %v726_v32 = vpop.f32.mrb[3].mxu0 }
 0x12b   :  { %v189_v33 = vpop.f32.mrb[4].mxu0 }
 0x12c   :  { %v190_v34 = vadd.f32 %v189_v33, %v138_v29  ;;  %v731_v35 = vpop.f32.mrb[5].mxu0 }
 0x12d   :  { %v192_v36 = vpop.f32.mrb[6].mxu0 }
 0x12e   :  { %v193_v37 = vadd.f32 %v192_v36, %v141_v31  ;;  %v732_v38 = vpop.f32.mrb[7].mxu0 }
 0x133   :  { %v250_v39 = vpop.f32.mrb[8].mxu0 }
 0x134   :  { %v257_v41 = vadd.f32 %v250_v39, %v190_v34  ;;  %v739_v42 = vpop.f32.mrb[9].mxu0 }
 0x135   :  { %v253_v44 = vpop.f32.mrb[10].mxu0 }
 0x136   :  { %v264_v45 = vadd.f32 %v649_v40, %v257_v41  ;;  %v258_v46 = vadd.f32 %v253_v44, %v193_v37  ;;  %v740_v47 = vpop.f32.mrb[11].mxu0 }
 0x138   :  { %v271_v48 = vmul.f32 %v650_v43, %v264_v45  ;;  %v265_v49 = vadd.f32 %v649_v40, %v258_v46 }
 0x13a   :  { %v272_v50 = vmul.f32 %v650_v43, %v265_v49  ;;  %v273_v51 = vmax.f32 %v264_v45, %v271_v48 }
 0x13c   :  { %v274_v52 = vmax.f32 %v265_v49, %v272_v50 }
 0x13e   :  { %v275_v53 = vpack.c.bf16 %v274_v52, %v273_v51 }
 0x140   :  { %758 = vmatmul.mubr.bf16.vlgmr.msra.gmra.mrb[0].mxu1 %v275_v53 }
 0x141   :  { %797 = vmatprep.mubr.msk.bf16.mxu1 %vm966_vm0, %v965_v0  ;;  %782 = vmatpush3.bf16.msra.mxu1 %v831_v56 }
 0x142   :  { %783 = vmatprep.subr.bf16.mxu1 %v965_v0 }
 0x145   :  { %784 = vmatpush3.bf16.msra.mxu1 %v832_v57 }
 0x146   :  { %785 = vmatprep.subr.bf16.mxu1 %v965_v0 }
 0x149   :  { %786 = vmatpush3.bf16.msra.mxu1 %v833_v58 }
 0x14a   :  { %787 = vmatprep.subr.bf16.mxu1 %v965_v0 }
 0x14d   :  { %788 = vmatpush3.bf16.msra.mxu1 %v834_v59 }
 0x14e   :  { %789 = vmatprep.subr.bf16.mxu1 %v965_v0 }
 0x151   :  { %790 = vmatpush3.bf16.msra.mxu1 %v835_v60 }
 0x152   :  { %791 = vmatprep.subr.bf16.mxu1 %v965_v0 }
 0x155   :  { %792 = vmatpush3.bf16.msra.mxu1 %v836_v61 }
 0x156   :  { %793 = vmatprep.subr.bf16.mxu1 %v965_v0 }
 0x159   :  { %794 = vmatpush3.bf16.msra.mxu1 %v837_v9 }
 0x15a   :  { %795 = vmatprep.subr.bf16.mxu1 %v965_v0  ;;  %v669_v0 = vld [vmem:[%s1169_s7 + $0x3] ss:$0 sm:$0xff] }
 0x15d   :  { %796 = vmatpush3.bf16.msra.mxu1 %v838_v10 }
 0x213   :  { %v379_v63 = vpop.f32.mrb[0].mxu1 }
 0x214   :  { %v380_v1 = vadd.f32 %v651_v62, %v379_v63  ;;  %v759_v2 = vpop.f32.mrb[1].mxu1 }
 0x215   :  { %v382_v3 = vpop.f32.mrb[2].mxu1 }
 0x216   :  { %v383_v4 = vadd.f32 %v651_v62, %v382_v3  ;;  %v760_v5 = vpop.f32.mrb[3].mxu1  ;;  %v386_v6 = vmax.f32 %v380_v1, 0.0 }
 0x218   :  { %v387_v7 = vmax.f32 %v383_v4, 0.0 }
 0x21a   :  { %v388_v8 = vpack.c.bf16 %v387_v7, %v386_v6 }
 0x21c   :  { %778 = vmatmul.mubr.bf16.vlgmr.msra.gmra.mrb[12].mxu0 %v388_v8 }
 0x2ef   :  { %v493_v12 = vpop.f32.mrb[12].mxu0 }
 0x2f0   :  { %v494_v13 = vadd.f32 %v660_v11, %v493_v12  ;;  %v779_v14 = vpop.f32.mrb[13].mxu0 }
 0x2f1   :  { %v496_v15 = vpop.f32.mrb[14].mxu0 }
 0x2f2   :  { %v497_v16 = vadd.f32 %v660_v11, %v496_v15  ;;  %v780_v17 = vpop.f32.mrb[15].mxu0  ;;  %v500_v18 = vmax.f32 %v494_v13, 0.0 }
 0x2f4   :  { %v501_v19 = vmax.f32 %v497_v16, 0.0 }
 0x2f6   :  { %v502_v20 = vpack.c.bf16 %v501_v19, %v500_v18 }
 0x2f8   :  { %798 = vmatmul.mubr.bf16.vlgmr.msra.gmra.mrb[4].mxu1 %v502_v20 }
 0x3cb   :  { %v607_v21 = vpop.f32.mrb[4].mxu1 }
 0x3cc   :  { %v799_v22 = vpop.f32.mrb[5].mxu1  ;;  %v608_v24 = vadd.f32 %v669_v0, %v607_v21 }
 0x3cd   :  { %v610_v23 = vpop.f32.mrb[6].mxu1 }
 0x3ce   :  { %v611_v25 = vadd.f32 %v669_v0, %v610_v23  ;;  %v800_v26 = vpop.f32.mrb[7].mxu1 }
 0x3d0   :  { %v685_v27 = vpack.c.bf16 %v611_v25, %v608_v24 }
 0x3d2   :  { %686 = vst [vmem:[#allocation10] sm:$0xff] %v685_v27  }
 0x3d3   :  { %938 = shalt.err (!%p935_p8)
}
 0x3d4   :  { %s939_s10 = scalar_lea.hbm %s1170_s8, 128 }
 0x3d5   :  { %p940_p9 = scmp.ne.s32.totalorder %s1170_s8, %s939_s10  ;;  %p943_p10 = scmp.lt.u32.totalorder %s939_s10, %s1170_s8 }
 0x3d7   :  { %p945_p11 = pnand %p943_p10, %p940_p9 }
 0x3d9   :  { %948 = shalt.err (!%p945_p11)
}
 0x3da   :  { %635 = dma.vmem_to_hbm [thread:$0]  %s630_s30, 128, %s1170_s8, [#allocation4], %s958_s15, %s958_s15, %s959_s16  }
 0x3db   :  { %955 = dma.done.wait [#allocation4], 128  }
 0x3dc   :  { %956 = vsyncadd [#allocation4], 4294967168 }
 0x3dd   :  { %639 = vsyncpa [#allocation3], 1 }
 0x3de   :  { %640 = vsyncpa [#allocation6], 1 }
 0x3df   :  { %641 = vsyncpa [#allocation9], 1 }
 0x3e0   :  { %642 = vsyncpa [#allocation4], 1 }

</bundles_post_ra>
